<compile_context>
chip_gen: v5e
topology: v5e:2x2
jax: 0.10.0
libtpu: 0.0.40
codegen_flags: <defaults>
</compile_context>

<pallas_src>
import jax
import jax.numpy as jnp
from jax.experimental import pallas as pl
from jax.experimental.pallas import tpu as pltpu

EMBEDDING_DIM = 5
NUM_ITEMS = 10001
NUM_USERS = 2001


def _als_gather_kernel(uidx_ref, iidx_ref, utab_hbm, itab_hbm, out_ref,
                       u_scr, i_scr, u_sems, i_sems):
    """HBM row-gather + fused multiply/reduce.

    uidx_ref / iidx_ref : SMEM int32 refs (B,)        (scalar prefetch)
    utab_hbm / itab_hbm : HBM f32 refs (rows, D)      (memory_space=pl.ANY)
    out_ref             : VMEM f32 ref (1, B)         (lane-dense output)
    u_scr / i_scr       : VMEM f32 (B, D) gather scratch
    u_sems / i_sems     : DMA semaphores, shape (B,)
    """
    B, _ = u_scr.shape
    num_users = utab_hbm.shape[0]
    num_items = itab_hbm.shape[0]

    # Issue all 2*B tiny row DMAs up front, then wait on all of them, so the
    # copies overlap each other.  B is small and static -> Python unroll.
    copies = []
    for b in range(B):
        u_idx = jnp.clip(uidx_ref[b], 0, num_users - 1)   # OOB guard (VMEM/HBM
        i_idx = jnp.clip(iidx_ref[b], 0, num_items - 1)   # reads are unchecked)
        cu = pltpu.make_async_copy(
            utab_hbm.at[pl.ds(u_idx, 1), :], u_scr.at[pl.ds(b, 1), :],
            u_sems.at[b])
        ci = pltpu.make_async_copy(
            itab_hbm.at[pl.ds(i_idx, 1), :], i_scr.at[pl.ds(b, 1), :],
            i_sems.at[b])
        cu.start()
        ci.start()
        copies.append(cu)
        copies.append(ci)
    for cp in copies:
        cp.wait()

    # Elementwise multiply + reduce over the embedding dim on the VPU; store
    # lane-dense as (1, B).  (MXU deliberately not used: D=5 would be >95%
    # padding on every TPU generation.)
    prod = u_scr[...] * i_scr[...]                       # (B, D)
    out_ref[...] = jnp.sum(prod, axis=1)[None, :]        # (1, B)


def als_forward(user_indices, item_indices, user_emb, item_emb):
    """Pallas equivalent of ALSModel.forward. Returns shape (B,) float32."""
    B = user_indices.shape[0]
    _, D = user_emb.shape

    # Only cast when actually needed (avoid full-table HBM copies pre-kernel).
    if user_indices.dtype != jnp.int32:
        user_indices = user_indices.astype(jnp.int32)
    if item_indices.dtype != jnp.int32:
        item_indices = item_indices.astype(jnp.int32)
    if user_emb.dtype != jnp.float32:
        user_emb = user_emb.astype(jnp.float32)
    if item_emb.dtype != jnp.float32:
        item_emb = item_emb.astype(jnp.float32)

    # TODO(synk): for large B, tile the batch with grid=(B//TB,) marked
    # "parallel" so v7x can shard across both TensorCores.
    out = pl.pallas_call(
        _als_gather_kernel,
        out_shape=jax.ShapeDtypeStruct((1, B), jnp.float32),
        grid_spec=pltpu.PrefetchScalarGridSpec(
            num_scalar_prefetch=2,      # user_indices, item_indices -> SMEM
            grid=(1,),
            in_specs=[
                # Tables remain in HBM; rows are fetched manually per index.
                pl.BlockSpec(memory_space=pl.ANY),
                pl.BlockSpec(memory_space=pl.ANY),
            ],
            out_specs=pl.BlockSpec((1, B), lambda i, u, it: (0, 0)),
            scratch_shapes=[
                pltpu.VMEM((B, D), jnp.float32),      # gathered user rows
                pltpu.VMEM((B, D), jnp.float32),      # gathered item rows
                pltpu.SemaphoreType.DMA((B,)),        # user-row DMA sems
                pltpu.SemaphoreType.DMA((B,)),        # item-row DMA sems
            ],
        ),
        compiler_params=pltpu.CompilerParams(
            dimension_semantics=("arbitrary",),
        ),
    )(user_indices, item_indices, user_emb, item_emb)
    return out[0]


if __name__ == "__main__":
    key = jax.random.PRNGKey(0)
    k_u, k_i, k_ui, k_ii = jax.random.split(key, 4)

    # Deterministic parameter init (nn.Embedding default: N(0, 1)).
    user_emb = jax.random.normal(k_u, (NUM_USERS, EMBEDDING_DIM), jnp.float32)
    item_emb = jax.random.normal(k_i, (NUM_ITEMS, EMBEDDING_DIM), jnp.float32)

    # Small batch of (user, item) index pairs.
    B = 8
    user_indices = jax.random.randint(k_ui, (B,), 0, NUM_USERS, jnp.int32)
    item_indices = jax.random.randint(k_ii, (B,), 0, NUM_ITEMS, jnp.int32)

    out = als_forward(user_indices, item_indices, user_emb, item_emb)
    out = jax.block_until_ready(out)

    # Pure-JAX reference for correctness.
    ref = jnp.sum(user_emb[user_indices] * item_emb[item_indices], axis=1)
    assert out.shape == (B,)
    assert jnp.allclose(out, ref, atol=1e-5, rtol=1e-5), (out, ref)

    print("KERNEL_OK")
</pallas_src>

<mosaic_0001>
module attributes {stable_mosaic.version = 11 : i64} {
  func.func @_als_gather_kernel(%arg0: i32, %arg1: memref<8xi32, #tpu.memory_space<smem>>, %arg2: memref<8xi32, #tpu.memory_space<smem>>, %arg3: memref<2001x5xf32, #tpu.memory_space<any>>, %arg4: memref<10001x5xf32, #tpu.memory_space<any>>, %arg5: memref<1x8xf32, #tpu.memory_space<vmem>>, %arg6: memref<8x5xf32, #tpu.memory_space<vmem>>, %arg7: memref<8x5xf32, #tpu.memory_space<vmem>>, %arg8: memref<8x!tpu.dma_semaphore, #tpu.memory_space<semaphore_mem>>, %arg9: memref<8x!tpu.dma_semaphore, #tpu.memory_space<semaphore_mem>>) attributes {dimension_semantics = [#tpu.dimension_semantics<arbitrary>], iteration_bounds = array<i64: 1>, scalar_prefetch = 2 : i64, scratch_operands = 4 : i64, tpu.core_type = #tpu.core_type<tc>, window_params = [{}, {}, {pipeline_mode = #tpu.pipeline_mode<synchronous>, transform_indices = @transform_2, window_bounds = array<i64: 1, 8>}]} {
    %c0 = arith.constant 0 : index
    %0 = memref.load %arg1[%c0] : memref<8xi32, #tpu.memory_space<smem>>
    %c0_i32 = arith.constant 0 : i32
    %c2000_i32 = arith.constant 2000 : i32
    %1 = arith.maxsi %c0_i32, %0 : i32
    %2 = arith.minsi %c2000_i32, %1 : i32
    %c0_0 = arith.constant 0 : index
    %3 = memref.load %arg2[%c0_0] : memref<8xi32, #tpu.memory_space<smem>>
    %c0_i32_1 = arith.constant 0 : i32
    %c10000_i32 = arith.constant 10000 : i32
    %4 = arith.maxsi %c0_i32_1, %3 : i32
    %5 = arith.minsi %c10000_i32, %4 : i32
    %c0_i32_2 = arith.constant 0 : i32
    %c0_i32_3 = arith.constant 0 : i32
    %6 = tpu.memref_slice %arg3[%2, %c0_i32_3] : memref<2001x5xf32, #tpu.memory_space<any>> -> memref<1x5xf32, #tpu.memory_space<any>>
    %c0_i32_4 = arith.constant 0 : i32
    %c0_i32_5 = arith.constant 0 : i32
    %7 = tpu.memref_slice %arg6[%c0_i32_4, %c0_i32_5] : memref<8x5xf32, #tpu.memory_space<vmem>> -> memref<1x5xf32, #tpu.memory_space<vmem>>
    %8 = tpu.memref_slice %arg8[%c0_i32_2] : memref<8x!tpu.dma_semaphore, #tpu.memory_space<semaphore_mem>> -> memref<1x!tpu.dma_semaphore, #tpu.memory_space<semaphore_mem>>
    %9 = tpu.memref_squeeze %8 : memref<1x!tpu.dma_semaphore, #tpu.memory_space<semaphore_mem>> -> memref<!tpu.dma_semaphore, #tpu.memory_space<semaphore_mem>>
    tpu.enqueue_dma source(%6 : memref<1x5xf32, #tpu.memory_space<any>>) target(%7 : memref<1x5xf32, #tpu.memory_space<vmem>>) target_semaphore(%9 : memref<!tpu.dma_semaphore, #tpu.memory_space<semaphore_mem>>)
    %c0_i32_6 = arith.constant 0 : i32
    %c0_i32_7 = arith.constant 0 : i32
    %10 = tpu.memref_slice %arg4[%5, %c0_i32_7] : memref<10001x5xf32, #tpu.memory_space<any>> -> memref<1x5xf32, #tpu.memory_space<any>>
    %c0_i32_8 = arith.constant 0 : i32
    %c0_i32_9 = arith.constant 0 : i32
    %11 = tpu.memref_slice %arg7[%c0_i32_8, %c0_i32_9] : memref<8x5xf32, #tpu.memory_space<vmem>> -> memref<1x5xf32, #tpu.memory_space<vmem>>
    %12 = tpu.memref_slice %arg9[%c0_i32_6] : memref<8x!tpu.dma_semaphore, #tpu.memory_space<semaphore_mem>> -> memref<1x!tpu.dma_semaphore, #tpu.memory_space<semaphore_mem>>
    %13 = tpu.memref_squeeze %12 : memref<1x!tpu.dma_semaphore, #tpu.memory_space<semaphore_mem>> -> memref<!tpu.dma_semaphore, #tpu.memory_space<semaphore_mem>>
    tpu.enqueue_dma source(%10 : memref<1x5xf32, #tpu.memory_space<any>>) target(%11 : memref<1x5xf32, #tpu.memory_space<vmem>>) target_semaphore(%13 : memref<!tpu.dma_semaphore, #tpu.memory_space<semaphore_mem>>)
    %c1 = arith.constant 1 : index
    %14 = memref.load %arg1[%c1] : memref<8xi32, #tpu.memory_space<smem>>
    %c0_i32_10 = arith.constant 0 : i32
    %c2000_i32_11 = arith.constant 2000 : i32
    %15 = arith.maxsi %c0_i32_10, %14 : i32
    %16 = arith.minsi %c2000_i32_11, %15 : i32
    %c1_12 = arith.constant 1 : index
    %17 = memref.load %arg2[%c1_12] : memref<8xi32, #tpu.memory_space<smem>>
    %c0_i32_13 = arith.constant 0 : i32
    %c10000_i32_14 = arith.constant 10000 : i32
    %18 = arith.maxsi %c0_i32_13, %17 : i32
    %19 = arith.minsi %c10000_i32_14, %18 : i32
    %c1_i32 = arith.constant 1 : i32
    %c0_i32_15 = arith.constant 0 : i32
    %20 = tpu.memref_slice %arg3[%16, %c0_i32_15] : memref<2001x5xf32, #tpu.memory_space<any>> -> memref<1x5xf32, #tpu.memory_space<any>>
    %c1_i32_16 = arith.constant 1 : i32
    %c0_i32_17 = arith.constant 0 : i32
    %21 = tpu.memref_slice %arg6[%c1_i32_16, %c0_i32_17] : memref<8x5xf32, #tpu.memory_space<vmem>> -> memref<1x5xf32, #tpu.memory_space<vmem>>
    %22 = tpu.memref_slice %arg8[%c1_i32] : memref<8x!tpu.dma_semaphore, #tpu.memory_space<semaphore_mem>> -> memref<1x!tpu.dma_semaphore, #tpu.memory_space<semaphore_mem>>
    %23 = tpu.memref_squeeze %22 : memref<1x!tpu.dma_semaphore, #tpu.memory_space<semaphore_mem>> -> memref<!tpu.dma_semaphore, #tpu.memory_space<semaphore_mem>>
    tpu.enqueue_dma source(%20 : memref<1x5xf32, #tpu.memory_space<any>>) target(%21 : memref<1x5xf32, #tpu.memory_space<vmem>>) target_semaphore(%23 : memref<!tpu.dma_semaphore, #tpu.memory_space<semaphore_mem>>)
    %c1_i32_18 = arith.constant 1 : i32
    %c0_i32_19 = arith.constant 0 : i32
    %24 = tpu.memref_slice %arg4[%19, %c0_i32_19] : memref<10001x5xf32, #tpu.memory_space<any>> -> memref<1x5xf32, #tpu.memory_space<any>>
    %c1_i32_20 = arith.constant 1 : i32
    %c0_i32_21 = arith.constant 0 : i32
    %25 = tpu.memref_slice %arg7[%c1_i32_20, %c0_i32_21] : memref<8x5xf32, #tpu.memory_space<vmem>> -> memref<1x5xf32, #tpu.memory_space<vmem>>
    %26 = tpu.memref_slice %arg9[%c1_i32_18] : memref<8x!tpu.dma_semaphore, #tpu.memory_space<semaphore_mem>> -> memref<1x!tpu.dma_semaphore, #tpu.memory_space<semaphore_mem>>
    %27 = tpu.memref_squeeze %26 : memref<1x!tpu.dma_semaphore, #tpu.memory_space<semaphore_mem>> -> memref<!tpu.dma_semaphore, #tpu.memory_space<semaphore_mem>>
    tpu.enqueue_dma source(%24 : memref<1x5xf32, #tpu.memory_space<any>>) target(%25 : memref<1x5xf32, #tpu.memory_space<vmem>>) target_semaphore(%27 : memref<!tpu.dma_semaphore, #tpu.memory_space<semaphore_mem>>)
    %c2 = arith.constant 2 : index
    %28 = memref.load %arg1[%c2] : memref<8xi32, #tpu.memory_space<smem>>
    %c0_i32_22 = arith.constant 0 : i32
    %c2000_i32_23 = arith.constant 2000 : i32
    %29 = arith.maxsi %c0_i32_22, %28 : i32
    %30 = arith.minsi %c2000_i32_23, %29 : i32
    %c2_24 = arith.constant 2 : index
    %31 = memref.load %arg2[%c2_24] : memref<8xi32, #tpu.memory_space<smem>>
    %c0_i32_25 = arith.constant 0 : i32
    %c10000_i32_26 = arith.constant 10000 : i32
    %32 = arith.maxsi %c0_i32_25, %31 : i32
    %33 = arith.minsi %c10000_i32_26, %32 : i32
    %c2_i32 = arith.constant 2 : i32
    %c0_i32_27 = arith.constant 0 : i32
    %34 = tpu.memref_slice %arg3[%30, %c0_i32_27] : memref<2001x5xf32, #tpu.memory_space<any>> -> memref<1x5xf32, #tpu.memory_space<any>>
    %c2_i32_28 = arith.constant 2 : i32
    %c0_i32_29 = arith.constant 0 : i32
    %35 = tpu.memref_slice %arg6[%c2_i32_28, %c0_i32_29] : memref<8x5xf32, #tpu.memory_space<vmem>> -> memref<1x5xf32, #tpu.memory_space<vmem>>
    %36 = tpu.memref_slice %arg8[%c2_i32] : memref<8x!tpu.dma_semaphore, #tpu.memory_space<semaphore_mem>> -> memref<1x!tpu.dma_semaphore, #tpu.memory_space<semaphore_mem>>
    %37 = tpu.memref_squeeze %36 : memref<1x!tpu.dma_semaphore, #tpu.memory_space<semaphore_mem>> -> memref<!tpu.dma_semaphore, #tpu.memory_space<semaphore_mem>>
    tpu.enqueue_dma source(%34 : memref<1x5xf32, #tpu.memory_space<any>>) target(%35 : memref<1x5xf32, #tpu.memory_space<vmem>>) target_semaphore(%37 : memref<!tpu.dma_semaphore, #tpu.memory_space<semaphore_mem>>)
    %c2_i32_30 = arith.constant 2 : i32
    %c0_i32_31 = arith.constant 0 : i32
    %38 = tpu.memref_slice %arg4[%33, %c0_i32_31] : memref<10001x5xf32, #tpu.memory_space<any>> -> memref<1x5xf32, #tpu.memory_space<any>>
    %c2_i32_32 = arith.constant 2 : i32
    %c0_i32_33 = arith.constant 0 : i32
    %39 = tpu.memref_slice %arg7[%c2_i32_32, %c0_i32_33] : memref<8x5xf32, #tpu.memory_space<vmem>> -> memref<1x5xf32, #tpu.memory_space<vmem>>
    %40 = tpu.memref_slice %arg9[%c2_i32_30] : memref<8x!tpu.dma_semaphore, #tpu.memory_space<semaphore_mem>> -> memref<1x!tpu.dma_semaphore, #tpu.memory_space<semaphore_mem>>
    %41 = tpu.memref_squeeze %40 : memref<1x!tpu.dma_semaphore, #tpu.memory_space<semaphore_mem>> -> memref<!tpu.dma_semaphore, #tpu.memory_space<semaphore_mem>>
    tpu.enqueue_dma source(%38 : memref<1x5xf32, #tpu.memory_space<any>>) target(%39 : memref<1x5xf32, #tpu.memory_space<vmem>>) target_semaphore(%41 : memref<!tpu.dma_semaphore, #tpu.memory_space<semaphore_mem>>)
    %c3 = arith.constant 3 : index
    %42 = memref.load %arg1[%c3] : memref<8xi32, #tpu.memory_space<smem>>
    %c0_i32_34 = arith.constant 0 : i32
    %c2000_i32_35 = arith.constant 2000 : i32
    %43 = arith.maxsi %c0_i32_34, %42 : i32
    %44 = arith.minsi %c2000_i32_35, %43 : i32
    %c3_36 = arith.constant 3 : index
    %45 = memref.load %arg2[%c3_36] : memref<8xi32, #tpu.memory_space<smem>>
    %c0_i32_37 = arith.constant 0 : i32
    %c10000_i32_38 = arith.constant 10000 : i32
    %46 = arith.maxsi %c0_i32_37, %45 : i32
    %47 = arith.minsi %c10000_i32_38, %46 : i32
    %c3_i32 = arith.constant 3 : i32
    %c0_i32_39 = arith.constant 0 : i32
    %48 = tpu.memref_slice %arg3[%44, %c0_i32_39] : memref<2001x5xf32, #tpu.memory_space<any>> -> memref<1x5xf32, #tpu.memory_space<any>>
    %c3_i32_40 = arith.constant 3 : i32
    %c0_i32_41 = arith.constant 0 : i32
    %49 = tpu.memref_slice %arg6[%c3_i32_40, %c0_i32_41] : memref<8x5xf32, #tpu.memory_space<vmem>> -> memref<1x5xf32, #tpu.memory_space<vmem>>
    %50 = tpu.memref_slice %arg8[%c3_i32] : memref<8x!tpu.dma_semaphore, #tpu.memory_space<semaphore_mem>> -> memref<1x!tpu.dma_semaphore, #tpu.memory_space<semaphore_mem>>
    %51 = tpu.memref_squeeze %50 : memref<1x!tpu.dma_semaphore, #tpu.memory_space<semaphore_mem>> -> memref<!tpu.dma_semaphore, #tpu.memory_space<semaphore_mem>>
    tpu.enqueue_dma source(%48 : memref<1x5xf32, #tpu.memory_space<any>>) target(%49 : memref<1x5xf32, #tpu.memory_space<vmem>>) target_semaphore(%51 : memref<!tpu.dma_semaphore, #tpu.memory_space<semaphore_mem>>)
    %c3_i32_42 = arith.constant 3 : i32
    %c0_i32_43 = arith.constant 0 : i32
    %52 = tpu.memref_slice %arg4[%47, %c0_i32_43] : memref<10001x5xf32, #tpu.memory_space<any>> -> memref<1x5xf32, #tpu.memory_space<any>>
    %c3_i32_44 = arith.constant 3 : i32
    %c0_i32_45 = arith.constant 0 : i32
    %53 = tpu.memref_slice %arg7[%c3_i32_44, %c0_i32_45] : memref<8x5xf32, #tpu.memory_space<vmem>> -> memref<1x5xf32, #tpu.memory_space<vmem>>
    %54 = tpu.memref_slice %arg9[%c3_i32_42] : memref<8x!tpu.dma_semaphore, #tpu.memory_space<semaphore_mem>> -> memref<1x!tpu.dma_semaphore, #tpu.memory_space<semaphore_mem>>
    %55 = tpu.memref_squeeze %54 : memref<1x!tpu.dma_semaphore, #tpu.memory_space<semaphore_mem>> -> memref<!tpu.dma_semaphore, #tpu.memory_space<semaphore_mem>>
    tpu.enqueue_dma source(%52 : memref<1x5xf32, #tpu.memory_space<any>>) target(%53 : memref<1x5xf32, #tpu.memory_space<vmem>>) target_semaphore(%55 : memref<!tpu.dma_semaphore, #tpu.memory_space<semaphore_mem>>)
    %c4 = arith.constant 4 : index
    %56 = memref.load %arg1[%c4] : memref<8xi32, #tpu.memory_space<smem>>
    %c0_i32_46 = arith.constant 0 : i32
    %c2000_i32_47 = arith.constant 2000 : i32
    %57 = arith.maxsi %c0_i32_46, %56 : i32
    %58 = arith.minsi %c2000_i32_47, %57 : i32
    %c4_48 = arith.constant 4 : index
    %59 = memref.load %arg2[%c4_48] : memref<8xi32, #tpu.memory_space<smem>>
    %c0_i32_49 = arith.constant 0 : i32
    %c10000_i32_50 = arith.constant 10000 : i32
    %60 = arith.maxsi %c0_i32_49, %59 : i32
    %61 = arith.minsi %c10000_i32_50, %60 : i32
    %c4_i32 = arith.constant 4 : i32
    %c0_i32_51 = arith.constant 0 : i32
    %62 = tpu.memref_slice %arg3[%58, %c0_i32_51] : memref<2001x5xf32, #tpu.memory_space<any>> -> memref<1x5xf32, #tpu.memory_space<any>>
    %c4_i32_52 = arith.constant 4 : i32
    %c0_i32_53 = arith.constant 0 : i32
    %63 = tpu.memref_slice %arg6[%c4_i32_52, %c0_i32_53] : memref<8x5xf32, #tpu.memory_space<vmem>> -> memref<1x5xf32, #tpu.memory_space<vmem>>
    %64 = tpu.memref_slice %arg8[%c4_i32] : memref<8x!tpu.dma_semaphore, #tpu.memory_space<semaphore_mem>> -> memref<1x!tpu.dma_semaphore, #tpu.memory_space<semaphore_mem>>
    %65 = tpu.memref_squeeze %64 : memref<1x!tpu.dma_semaphore, #tpu.memory_space<semaphore_mem>> -> memref<!tpu.dma_semaphore, #tpu.memory_space<semaphore_mem>>
    tpu.enqueue_dma source(%62 : memref<1x5xf32, #tpu.memory_space<any>>) target(%63 : memref<1x5xf32, #tpu.memory_space<vmem>>) target_semaphore(%65 : memref<!tpu.dma_semaphore, #tpu.memory_space<semaphore_mem>>)
    %c4_i32_54 = arith.constant 4 : i32
    %c0_i32_55 = arith.constant 0 : i32
    %66 = tpu.memref_slice %arg4[%61, %c0_i32_55] : memref<10001x5xf32, #tpu.memory_space<any>> -> memref<1x5xf32, #tpu.memory_space<any>>
    %c4_i32_56 = arith.constant 4 : i32
    %c0_i32_57 = arith.constant 0 : i32
    %67 = tpu.memref_slice %arg7[%c4_i32_56, %c0_i32_57] : memref<8x5xf32, #tpu.memory_space<vmem>> -> memref<1x5xf32, #tpu.memory_space<vmem>>
    %68 = tpu.memref_slice %arg9[%c4_i32_54] : memref<8x!tpu.dma_semaphore, #tpu.memory_space<semaphore_mem>> -> memref<1x!tpu.dma_semaphore, #tpu.memory_space<semaphore_mem>>
    %69 = tpu.memref_squeeze %68 : memref<1x!tpu.dma_semaphore, #tpu.memory_space<semaphore_mem>> -> memref<!tpu.dma_semaphore, #tpu.memory_space<semaphore_mem>>
    tpu.enqueue_dma source(%66 : memref<1x5xf32, #tpu.memory_space<any>>) target(%67 : memref<1x5xf32, #tpu.memory_space<vmem>>) target_semaphore(%69 : memref<!tpu.dma_semaphore, #tpu.memory_space<semaphore_mem>>)
    %c5 = arith.constant 5 : index
    %70 = memref.load %arg1[%c5] : memref<8xi32, #tpu.memory_space<smem>>
    %c0_i32_58 = arith.constant 0 : i32
    %c2000_i32_59 = arith.constant 2000 : i32
    %71 = arith.maxsi %c0_i32_58, %70 : i32
    %72 = arith.minsi %c2000_i32_59, %71 : i32
    %c5_60 = arith.constant 5 : index
    %73 = memref.load %arg2[%c5_60] : memref<8xi32, #tpu.memory_space<smem>>
    %c0_i32_61 = arith.constant 0 : i32
    %c10000_i32_62 = arith.constant 10000 : i32
    %74 = arith.maxsi %c0_i32_61, %73 : i32
    %75 = arith.minsi %c10000_i32_62, %74 : i32
    %c5_i32 = arith.constant 5 : i32
    %c0_i32_63 = arith.constant 0 : i32
    %76 = tpu.memref_slice %arg3[%72, %c0_i32_63] : memref<2001x5xf32, #tpu.memory_space<any>> -> memref<1x5xf32, #tpu.memory_space<any>>
    %c5_i32_64 = arith.constant 5 : i32
    %c0_i32_65 = arith.constant 0 : i32
    %77 = tpu.memref_slice %arg6[%c5_i32_64, %c0_i32_65] : memref<8x5xf32, #tpu.memory_space<vmem>> -> memref<1x5xf32, #tpu.memory_space<vmem>>
    %78 = tpu.memref_slice %arg8[%c5_i32] : memref<8x!tpu.dma_semaphore, #tpu.memory_space<semaphore_mem>> -> memref<1x!tpu.dma_semaphore, #tpu.memory_space<semaphore_mem>>
    %79 = tpu.memref_squeeze %78 : memref<1x!tpu.dma_semaphore, #tpu.memory_space<semaphore_mem>> -> memref<!tpu.dma_semaphore, #tpu.memory_space<semaphore_mem>>
    tpu.enqueue_dma source(%76 : memref<1x5xf32, #tpu.memory_space<any>>) target(%77 : memref<1x5xf32, #tpu.memory_space<vmem>>) target_semaphore(%79 : memref<!tpu.dma_semaphore, #tpu.memory_space<semaphore_mem>>)
    %c5_i32_66 = arith.constant 5 : i32
    %c0_i32_67 = arith.constant 0 : i32
    %80 = tpu.memref_slice %arg4[%75, %c0_i32_67] : memref<10001x5xf32, #tpu.memory_space<any>> -> memref<1x5xf32, #tpu.memory_space<any>>
    %c5_i32_68 = arith.constant 5 : i32
    %c0_i32_69 = arith.constant 0 : i32
    %81 = tpu.memref_slice %arg7[%c5_i32_68, %c0_i32_69] : memref<8x5xf32, #tpu.memory_space<vmem>> -> memref<1x5xf32, #tpu.memory_space<vmem>>
    %82 = tpu.memref_slice %arg9[%c5_i32_66] : memref<8x!tpu.dma_semaphore, #tpu.memory_space<semaphore_mem>> -> memref<1x!tpu.dma_semaphore, #tpu.memory_space<semaphore_mem>>
    %83 = tpu.memref_squeeze %82 : memref<1x!tpu.dma_semaphore, #tpu.memory_space<semaphore_mem>> -> memref<!tpu.dma_semaphore, #tpu.memory_space<semaphore_mem>>
    tpu.enqueue_dma source(%80 : memref<1x5xf32, #tpu.memory_space<any>>) target(%81 : memref<1x5xf32, #tpu.memory_space<vmem>>) target_semaphore(%83 : memref<!tpu.dma_semaphore, #tpu.memory_space<semaphore_mem>>)
    %c6 = arith.constant 6 : index
    %84 = memref.load %arg1[%c6] : memref<8xi32, #tpu.memory_space<smem>>
    %c0_i32_70 = arith.constant 0 : i32
    %c2000_i32_71 = arith.constant 2000 : i32
    %85 = arith.maxsi %c0_i32_70, %84 : i32
    %86 = arith.minsi %c2000_i32_71, %85 : i32
    %c6_72 = arith.constant 6 : index
    %87 = memref.load %arg2[%c6_72] : memref<8xi32, #tpu.memory_space<smem>>
    %c0_i32_73 = arith.constant 0 : i32
    %c10000_i32_74 = arith.constant 10000 : i32
    %88 = arith.maxsi %c0_i32_73, %87 : i32
    %89 = arith.minsi %c10000_i32_74, %88 : i32
    %c6_i32 = arith.constant 6 : i32
    %c0_i32_75 = arith.constant 0 : i32
    %90 = tpu.memref_slice %arg3[%86, %c0_i32_75] : memref<2001x5xf32, #tpu.memory_space<any>> -> memref<1x5xf32, #tpu.memory_space<any>>
    %c6_i32_76 = arith.constant 6 : i32
    %c0_i32_77 = arith.constant 0 : i32
    %91 = tpu.memref_slice %arg6[%c6_i32_76, %c0_i32_77] : memref<8x5xf32, #tpu.memory_space<vmem>> -> memref<1x5xf32, #tpu.memory_space<vmem>>
    %92 = tpu.memref_slice %arg8[%c6_i32] : memref<8x!tpu.dma_semaphore, #tpu.memory_space<semaphore_mem>> -> memref<1x!tpu.dma_semaphore, #tpu.memory_space<semaphore_mem>>
    %93 = tpu.memref_squeeze %92 : memref<1x!tpu.dma_semaphore, #tpu.memory_space<semaphore_mem>> -> memref<!tpu.dma_semaphore, #tpu.memory_space<semaphore_mem>>
    tpu.enqueue_dma source(%90 : memref<1x5xf32, #tpu.memory_space<any>>) target(%91 : memref<1x5xf32, #tpu.memory_space<vmem>>) target_semaphore(%93 : memref<!tpu.dma_semaphore, #tpu.memory_space<semaphore_mem>>)
    %c6_i32_78 = arith.constant 6 : i32
    %c0_i32_79 = arith.constant 0 : i32
    %94 = tpu.memref_slice %arg4[%89, %c0_i32_79] : memref<10001x5xf32, #tpu.memory_space<any>> -> memref<1x5xf32, #tpu.memory_space<any>>
    %c6_i32_80 = arith.constant 6 : i32
    %c0_i32_81 = arith.constant 0 : i32
    %95 = tpu.memref_slice %arg7[%c6_i32_80, %c0_i32_81] : memref<8x5xf32, #tpu.memory_space<vmem>> -> memref<1x5xf32, #tpu.memory_space<vmem>>
    %96 = tpu.memref_slice %arg9[%c6_i32_78] : memref<8x!tpu.dma_semaphore, #tpu.memory_space<semaphore_mem>> -> memref<1x!tpu.dma_semaphore, #tpu.memory_space<semaphore_mem>>
    %97 = tpu.memref_squeeze %96 : memref<1x!tpu.dma_semaphore, #tpu.memory_space<semaphore_mem>> -> memref<!tpu.dma_semaphore, #tpu.memory_space<semaphore_mem>>
    tpu.enqueue_dma source(%94 : memref<1x5xf32, #tpu.memory_space<any>>) target(%95 : memref<1x5xf32, #tpu.memory_space<vmem>>) target_semaphore(%97 : memref<!tpu.dma_semaphore, #tpu.memory_space<semaphore_mem>>)
    %c7 = arith.constant 7 : index
    %98 = memref.load %arg1[%c7] : memref<8xi32, #tpu.memory_space<smem>>
    %c0_i32_82 = arith.constant 0 : i32
    %c2000_i32_83 = arith.constant 2000 : i32
    %99 = arith.maxsi %c0_i32_82, %98 : i32
    %100 = arith.minsi %c2000_i32_83, %99 : i32
    %c7_84 = arith.constant 7 : index
    %101 = memref.load %arg2[%c7_84] : memref<8xi32, #tpu.memory_space<smem>>
    %c0_i32_85 = arith.constant 0 : i32
    %c10000_i32_86 = arith.constant 10000 : i32
    %102 = arith.maxsi %c0_i32_85, %101 : i32
    %103 = arith.minsi %c10000_i32_86, %102 : i32
    %c7_i32 = arith.constant 7 : i32
    %c0_i32_87 = arith.constant 0 : i32
    %104 = tpu.memref_slice %arg3[%100, %c0_i32_87] : memref<2001x5xf32, #tpu.memory_space<any>> -> memref<1x5xf32, #tpu.memory_space<any>>
    %c7_i32_88 = arith.constant 7 : i32
    %c0_i32_89 = arith.constant 0 : i32
    %105 = tpu.memref_slice %arg6[%c7_i32_88, %c0_i32_89] : memref<8x5xf32, #tpu.memory_space<vmem>> -> memref<1x5xf32, #tpu.memory_space<vmem>>
    %106 = tpu.memref_slice %arg8[%c7_i32] : memref<8x!tpu.dma_semaphore, #tpu.memory_space<semaphore_mem>> -> memref<1x!tpu.dma_semaphore, #tpu.memory_space<semaphore_mem>>
    %107 = tpu.memref_squeeze %106 : memref<1x!tpu.dma_semaphore, #tpu.memory_space<semaphore_mem>> -> memref<!tpu.dma_semaphore, #tpu.memory_space<semaphore_mem>>
    tpu.enqueue_dma source(%104 : memref<1x5xf32, #tpu.memory_space<any>>) target(%105 : memref<1x5xf32, #tpu.memory_space<vmem>>) target_semaphore(%107 : memref<!tpu.dma_semaphore, #tpu.memory_space<semaphore_mem>>)
    %c7_i32_90 = arith.constant 7 : i32
    %c0_i32_91 = arith.constant 0 : i32
    %108 = tpu.memref_slice %arg4[%103, %c0_i32_91] : memref<10001x5xf32, #tpu.memory_space<any>> -> memref<1x5xf32, #tpu.memory_space<any>>
    %c7_i32_92 = arith.constant 7 : i32
    %c0_i32_93 = arith.constant 0 : i32
    %109 = tpu.memref_slice %arg7[%c7_i32_92, %c0_i32_93] : memref<8x5xf32, #tpu.memory_space<vmem>> -> memref<1x5xf32, #tpu.memory_space<vmem>>
    %110 = tpu.memref_slice %arg9[%c7_i32_90] : memref<8x!tpu.dma_semaphore, #tpu.memory_space<semaphore_mem>> -> memref<1x!tpu.dma_semaphore, #tpu.memory_space<semaphore_mem>>
    %111 = tpu.memref_squeeze %110 : memref<1x!tpu.dma_semaphore, #tpu.memory_space<semaphore_mem>> -> memref<!tpu.dma_semaphore, #tpu.memory_space<semaphore_mem>>
    tpu.enqueue_dma source(%108 : memref<1x5xf32, #tpu.memory_space<any>>) target(%109 : memref<1x5xf32, #tpu.memory_space<vmem>>) target_semaphore(%111 : memref<!tpu.dma_semaphore, #tpu.memory_space<semaphore_mem>>)
    %c0_i32_94 = arith.constant 0 : i32
    %c0_i32_95 = arith.constant 0 : i32
    %112 = tpu.memref_slice %arg3[%2, %c0_i32_95] : memref<2001x5xf32, #tpu.memory_space<any>> -> memref<1x5xf32, #tpu.memory_space<any>>
    %c0_i32_96 = arith.constant 0 : i32
    %c0_i32_97 = arith.constant 0 : i32
    %113 = tpu.memref_slice %arg6[%c0_i32_96, %c0_i32_97] : memref<8x5xf32, #tpu.memory_space<vmem>> -> memref<1x5xf32, #tpu.memory_space<vmem>>
    %114 = tpu.memref_slice %arg8[%c0_i32_94] : memref<8x!tpu.dma_semaphore, #tpu.memory_space<semaphore_mem>> -> memref<1x!tpu.dma_semaphore, #tpu.memory_space<semaphore_mem>>
    %115 = tpu.memref_squeeze %114 : memref<1x!tpu.dma_semaphore, #tpu.memory_space<semaphore_mem>> -> memref<!tpu.dma_semaphore, #tpu.memory_space<semaphore_mem>>
    tpu.wait_dma2 semaphore(%115 : memref<!tpu.dma_semaphore, #tpu.memory_space<semaphore_mem>>) src(%112 : memref<1x5xf32, #tpu.memory_space<any>>) dst(%113 : memref<1x5xf32, #tpu.memory_space<vmem>>)
    %c0_i32_98 = arith.constant 0 : i32
    %c0_i32_99 = arith.constant 0 : i32
    %116 = tpu.memref_slice %arg4[%5, %c0_i32_99] : memref<10001x5xf32, #tpu.memory_space<any>> -> memref<1x5xf32, #tpu.memory_space<any>>
    %c0_i32_100 = arith.constant 0 : i32
    %c0_i32_101 = arith.constant 0 : i32
    %117 = tpu.memref_slice %arg7[%c0_i32_100, %c0_i32_101] : memref<8x5xf32, #tpu.memory_space<vmem>> -> memref<1x5xf32, #tpu.memory_space<vmem>>
    %118 = tpu.memref_slice %arg9[%c0_i32_98] : memref<8x!tpu.dma_semaphore, #tpu.memory_space<semaphore_mem>> -> memref<1x!tpu.dma_semaphore, #tpu.memory_space<semaphore_mem>>
    %119 = tpu.memref_squeeze %118 : memref<1x!tpu.dma_semaphore, #tpu.memory_space<semaphore_mem>> -> memref<!tpu.dma_semaphore, #tpu.memory_space<semaphore_mem>>
    tpu.wait_dma2 semaphore(%119 : memref<!tpu.dma_semaphore, #tpu.memory_space<semaphore_mem>>) src(%116 : memref<1x5xf32, #tpu.memory_space<any>>) dst(%117 : memref<1x5xf32, #tpu.memory_space<vmem>>)
    %c1_i32_102 = arith.constant 1 : i32
    %c0_i32_103 = arith.constant 0 : i32
    %120 = tpu.memref_slice %arg3[%16, %c0_i32_103] : memref<2001x5xf32, #tpu.memory_space<any>> -> memref<1x5xf32, #tpu.memory_space<any>>
    %c1_i32_104 = arith.constant 1 : i32
    %c0_i32_105 = arith.constant 0 : i32
    %121 = tpu.memref_slice %arg6[%c1_i32_104, %c0_i32_105] : memref<8x5xf32, #tpu.memory_space<vmem>> -> memref<1x5xf32, #tpu.memory_space<vmem>>
    %122 = tpu.memref_slice %arg8[%c1_i32_102] : memref<8x!tpu.dma_semaphore, #tpu.memory_space<semaphore_mem>> -> memref<1x!tpu.dma_semaphore, #tpu.memory_space<semaphore_mem>>
    %123 = tpu.memref_squeeze %122 : memref<1x!tpu.dma_semaphore, #tpu.memory_space<semaphore_mem>> -> memref<!tpu.dma_semaphore, #tpu.memory_space<semaphore_mem>>
    tpu.wait_dma2 semaphore(%123 : memref<!tpu.dma_semaphore, #tpu.memory_space<semaphore_mem>>) src(%120 : memref<1x5xf32, #tpu.memory_space<any>>) dst(%121 : memref<1x5xf32, #tpu.memory_space<vmem>>)
    %c1_i32_106 = arith.constant 1 : i32
    %c0_i32_107 = arith.constant 0 : i32
    %124 = tpu.memref_slice %arg4[%19, %c0_i32_107] : memref<10001x5xf32, #tpu.memory_space<any>> -> memref<1x5xf32, #tpu.memory_space<any>>
    %c1_i32_108 = arith.constant 1 : i32
    %c0_i32_109 = arith.constant 0 : i32
    %125 = tpu.memref_slice %arg7[%c1_i32_108, %c0_i32_109] : memref<8x5xf32, #tpu.memory_space<vmem>> -> memref<1x5xf32, #tpu.memory_space<vmem>>
    %126 = tpu.memref_slice %arg9[%c1_i32_106] : memref<8x!tpu.dma_semaphore, #tpu.memory_space<semaphore_mem>> -> memref<1x!tpu.dma_semaphore, #tpu.memory_space<semaphore_mem>>
    %127 = tpu.memref_squeeze %126 : memref<1x!tpu.dma_semaphore, #tpu.memory_space<semaphore_mem>> -> memref<!tpu.dma_semaphore, #tpu.memory_space<semaphore_mem>>
    tpu.wait_dma2 semaphore(%127 : memref<!tpu.dma_semaphore, #tpu.memory_space<semaphore_mem>>) src(%124 : memref<1x5xf32, #tpu.memory_space<any>>) dst(%125 : memref<1x5xf32, #tpu.memory_space<vmem>>)
    %c2_i32_110 = arith.constant 2 : i32
    %c0_i32_111 = arith.constant 0 : i32
    %128 = tpu.memref_slice %arg3[%30, %c0_i32_111] : memref<2001x5xf32, #tpu.memory_space<any>> -> memref<1x5xf32, #tpu.memory_space<any>>
    %c2_i32_112 = arith.constant 2 : i32
    %c0_i32_113 = arith.constant 0 : i32
    %129 = tpu.memref_slice %arg6[%c2_i32_112, %c0_i32_113] : memref<8x5xf32, #tpu.memory_space<vmem>> -> memref<1x5xf32, #tpu.memory_space<vmem>>
    %130 = tpu.memref_slice %arg8[%c2_i32_110] : memref<8x!tpu.dma_semaphore, #tpu.memory_space<semaphore_mem>> -> memref<1x!tpu.dma_semaphore, #tpu.memory_space<semaphore_mem>>
    %131 = tpu.memref_squeeze %130 : memref<1x!tpu.dma_semaphore, #tpu.memory_space<semaphore_mem>> -> memref<!tpu.dma_semaphore, #tpu.memory_space<semaphore_mem>>
    tpu.wait_dma2 semaphore(%131 : memref<!tpu.dma_semaphore, #tpu.memory_space<semaphore_mem>>) src(%128 : memref<1x5xf32, #tpu.memory_space<any>>) dst(%129 : memref<1x5xf32, #tpu.memory_space<vmem>>)
    %c2_i32_114 = arith.constant 2 : i32
    %c0_i32_115 = arith.constant 0 : i32
    %132 = tpu.memref_slice %arg4[%33, %c0_i32_115] : memref<10001x5xf32, #tpu.memory_space<any>> -> memref<1x5xf32, #tpu.memory_space<any>>
    %c2_i32_116 = arith.constant 2 : i32
    %c0_i32_117 = arith.constant 0 : i32
    %133 = tpu.memref_slice %arg7[%c2_i32_116, %c0_i32_117] : memref<8x5xf32, #tpu.memory_space<vmem>> -> memref<1x5xf32, #tpu.memory_space<vmem>>
    %134 = tpu.memref_slice %arg9[%c2_i32_114] : memref<8x!tpu.dma_semaphore, #tpu.memory_space<semaphore_mem>> -> memref<1x!tpu.dma_semaphore, #tpu.memory_space<semaphore_mem>>
    %135 = tpu.memref_squeeze %134 : memref<1x!tpu.dma_semaphore, #tpu.memory_space<semaphore_mem>> -> memref<!tpu.dma_semaphore, #tpu.memory_space<semaphore_mem>>
    tpu.wait_dma2 semaphore(%135 : memref<!tpu.dma_semaphore, #tpu.memory_space<semaphore_mem>>) src(%132 : memref<1x5xf32, #tpu.memory_space<any>>) dst(%133 : memref<1x5xf32, #tpu.memory_space<vmem>>)
    %c3_i32_118 = arith.constant 3 : i32
    %c0_i32_119 = arith.constant 0 : i32
    %136 = tpu.memref_slice %arg3[%44, %c0_i32_119] : memref<2001x5xf32, #tpu.memory_space<any>> -> memref<1x5xf32, #tpu.memory_space<any>>
    %c3_i32_120 = arith.constant 3 : i32
    %c0_i32_121 = arith.constant 0 : i32
    %137 = tpu.memref_slice %arg6[%c3_i32_120, %c0_i32_121] : memref<8x5xf32, #tpu.memory_space<vmem>> -> memref<1x5xf32, #tpu.memory_space<vmem>>
    %138 = tpu.memref_slice %arg8[%c3_i32_118] : memref<8x!tpu.dma_semaphore, #tpu.memory_space<semaphore_mem>> -> memref<1x!tpu.dma_semaphore, #tpu.memory_space<semaphore_mem>>
    %139 = tpu.memref_squeeze %138 : memref<1x!tpu.dma_semaphore, #tpu.memory_space<semaphore_mem>> -> memref<!tpu.dma_semaphore, #tpu.memory_space<semaphore_mem>>
    tpu.wait_dma2 semaphore(%139 : memref<!tpu.dma_semaphore, #tpu.memory_space<semaphore_mem>>) src(%136 : memref<1x5xf32, #tpu.memory_space<any>>) dst(%137 : memref<1x5xf32, #tpu.memory_space<vmem>>)
    %c3_i32_122 = arith.constant 3 : i32
    %c0_i32_123 = arith.constant 0 : i32
    %140 = tpu.memref_slice %arg4[%47, %c0_i32_123] : memref<10001x5xf32, #tpu.memory_space<any>> -> memref<1x5xf32, #tpu.memory_space<any>>
    %c3_i32_124 = arith.constant 3 : i32
    %c0_i32_125 = arith.constant 0 : i32
    %141 = tpu.memref_slice %arg7[%c3_i32_124, %c0_i32_125] : memref<8x5xf32, #tpu.memory_space<vmem>> -> memref<1x5xf32, #tpu.memory_space<vmem>>
    %142 = tpu.memref_slice %arg9[%c3_i32_122] : memref<8x!tpu.dma_semaphore, #tpu.memory_space<semaphore_mem>> -> memref<1x!tpu.dma_semaphore, #tpu.memory_space<semaphore_mem>>
    %143 = tpu.memref_squeeze %142 : memref<1x!tpu.dma_semaphore, #tpu.memory_space<semaphore_mem>> -> memref<!tpu.dma_semaphore, #tpu.memory_space<semaphore_mem>>
    tpu.wait_dma2 semaphore(%143 : memref<!tpu.dma_semaphore, #tpu.memory_space<semaphore_mem>>) src(%140 : memref<1x5xf32, #tpu.memory_space<any>>) dst(%141 : memref<1x5xf32, #tpu.memory_space<vmem>>)
    %c4_i32_126 = arith.constant 4 : i32
    %c0_i32_127 = arith.constant 0 : i32
    %144 = tpu.memref_slice %arg3[%58, %c0_i32_127] : memref<2001x5xf32, #tpu.memory_space<any>> -> memref<1x5xf32, #tpu.memory_space<any>>
    %c4_i32_128 = arith.constant 4 : i32
    %c0_i32_129 = arith.constant 0 : i32
    %145 = tpu.memref_slice %arg6[%c4_i32_128, %c0_i32_129] : memref<8x5xf32, #tpu.memory_space<vmem>> -> memref<1x5xf32, #tpu.memory_space<vmem>>
    %146 = tpu.memref_slice %arg8[%c4_i32_126] : memref<8x!tpu.dma_semaphore, #tpu.memory_space<semaphore_mem>> -> memref<1x!tpu.dma_semaphore, #tpu.memory_space<semaphore_mem>>
    %147 = tpu.memref_squeeze %146 : memref<1x!tpu.dma_semaphore, #tpu.memory_space<semaphore_mem>> -> memref<!tpu.dma_semaphore, #tpu.memory_space<semaphore_mem>>
    tpu.wait_dma2 semaphore(%147 : memref<!tpu.dma_semaphore, #tpu.memory_space<semaphore_mem>>) src(%144 : memref<1x5xf32, #tpu.memory_space<any>>) dst(%145 : memref<1x5xf32, #tpu.memory_space<vmem>>)
    %c4_i32_130 = arith.constant 4 : i32
    %c0_i32_131 = arith.constant 0 : i32
    %148 = tpu.memref_slice %arg4[%61, %c0_i32_131] : memref<10001x5xf32, #tpu.memory_space<any>> -> memref<1x5xf32, #tpu.memory_space<any>>
    %c4_i32_132 = arith.constant 4 : i32
    %c0_i32_133 = arith.constant 0 : i32
    %149 = tpu.memref_slice %arg7[%c4_i32_132, %c0_i32_133] : memref<8x5xf32, #tpu.memory_space<vmem>> -> memref<1x5xf32, #tpu.memory_space<vmem>>
    %150 = tpu.memref_slice %arg9[%c4_i32_130] : memref<8x!tpu.dma_semaphore, #tpu.memory_space<semaphore_mem>> -> memref<1x!tpu.dma_semaphore, #tpu.memory_space<semaphore_mem>>
    %151 = tpu.memref_squeeze %150 : memref<1x!tpu.dma_semaphore, #tpu.memory_space<semaphore_mem>> -> memref<!tpu.dma_semaphore, #tpu.memory_space<semaphore_mem>>
    tpu.wait_dma2 semaphore(%151 : memref<!tpu.dma_semaphore, #tpu.memory_space<semaphore_mem>>) src(%148 : memref<1x5xf32, #tpu.memory_space<any>>) dst(%149 : memref<1x5xf32, #tpu.memory_space<vmem>>)
    %c5_i32_134 = arith.constant 5 : i32
    %c0_i32_135 = arith.constant 0 : i32
    %152 = tpu.memref_slice %arg3[%72, %c0_i32_135] : memref<2001x5xf32, #tpu.memory_space<any>> -> memref<1x5xf32, #tpu.memory_space<any>>
    %c5_i32_136 = arith.constant 5 : i32
    %c0_i32_137 = arith.constant 0 : i32
    %153 = tpu.memref_slice %arg6[%c5_i32_136, %c0_i32_137] : memref<8x5xf32, #tpu.memory_space<vmem>> -> memref<1x5xf32, #tpu.memory_space<vmem>>
    %154 = tpu.memref_slice %arg8[%c5_i32_134] : memref<8x!tpu.dma_semaphore, #tpu.memory_space<semaphore_mem>> -> memref<1x!tpu.dma_semaphore, #tpu.memory_space<semaphore_mem>>
    %155 = tpu.memref_squeeze %154 : memref<1x!tpu.dma_semaphore, #tpu.memory_space<semaphore_mem>> -> memref<!tpu.dma_semaphore, #tpu.memory_space<semaphore_mem>>
    tpu.wait_dma2 semaphore(%155 : memref<!tpu.dma_semaphore, #tpu.memory_space<semaphore_mem>>) src(%152 : memref<1x5xf32, #tpu.memory_space<any>>) dst(%153 : memref<1x5xf32, #tpu.memory_space<vmem>>)
    %c5_i32_138 = arith.constant 5 : i32
    %c0_i32_139 = arith.constant 0 : i32
    %156 = tpu.memref_slice %arg4[%75, %c0_i32_139] : memref<10001x5xf32, #tpu.memory_space<any>> -> memref<1x5xf32, #tpu.memory_space<any>>
    %c5_i32_140 = arith.constant 5 : i32
    %c0_i32_141 = arith.constant 0 : i32
    %157 = tpu.memref_slice %arg7[%c5_i32_140, %c0_i32_141] : memref<8x5xf32, #tpu.memory_space<vmem>> -> memref<1x5xf32, #tpu.memory_space<vmem>>
    %158 = tpu.memref_slice %arg9[%c5_i32_138] : memref<8x!tpu.dma_semaphore, #tpu.memory_space<semaphore_mem>> -> memref<1x!tpu.dma_semaphore, #tpu.memory_space<semaphore_mem>>
    %159 = tpu.memref_squeeze %158 : memref<1x!tpu.dma_semaphore, #tpu.memory_space<semaphore_mem>> -> memref<!tpu.dma_semaphore, #tpu.memory_space<semaphore_mem>>
    tpu.wait_dma2 semaphore(%159 : memref<!tpu.dma_semaphore, #tpu.memory_space<semaphore_mem>>) src(%156 : memref<1x5xf32, #tpu.memory_space<any>>) dst(%157 : memref<1x5xf32, #tpu.memory_space<vmem>>)
    %c6_i32_142 = arith.constant 6 : i32
    %c0_i32_143 = arith.constant 0 : i32
    %160 = tpu.memref_slice %arg3[%86, %c0_i32_143] : memref<2001x5xf32, #tpu.memory_space<any>> -> memref<1x5xf32, #tpu.memory_space<any>>
    %c6_i32_144 = arith.constant 6 : i32
    %c0_i32_145 = arith.constant 0 : i32
    %161 = tpu.memref_slice %arg6[%c6_i32_144, %c0_i32_145] : memref<8x5xf32, #tpu.memory_space<vmem>> -> memref<1x5xf32, #tpu.memory_space<vmem>>
    %162 = tpu.memref_slice %arg8[%c6_i32_142] : memref<8x!tpu.dma_semaphore, #tpu.memory_space<semaphore_mem>> -> memref<1x!tpu.dma_semaphore, #tpu.memory_space<semaphore_mem>>
    %163 = tpu.memref_squeeze %162 : memref<1x!tpu.dma_semaphore, #tpu.memory_space<semaphore_mem>> -> memref<!tpu.dma_semaphore, #tpu.memory_space<semaphore_mem>>
    tpu.wait_dma2 semaphore(%163 : memref<!tpu.dma_semaphore, #tpu.memory_space<semaphore_mem>>) src(%160 : memref<1x5xf32, #tpu.memory_space<any>>) dst(%161 : memref<1x5xf32, #tpu.memory_space<vmem>>)
    %c6_i32_146 = arith.constant 6 : i32
    %c0_i32_147 = arith.constant 0 : i32
    %164 = tpu.memref_slice %arg4[%89, %c0_i32_147] : memref<10001x5xf32, #tpu.memory_space<any>> -> memref<1x5xf32, #tpu.memory_space<any>>
    %c6_i32_148 = arith.constant 6 : i32
    %c0_i32_149 = arith.constant 0 : i32
    %165 = tpu.memref_slice %arg7[%c6_i32_148, %c0_i32_149] : memref<8x5xf32, #tpu.memory_space<vmem>> -> memref<1x5xf32, #tpu.memory_space<vmem>>
    %166 = tpu.memref_slice %arg9[%c6_i32_146] : memref<8x!tpu.dma_semaphore, #tpu.memory_space<semaphore_mem>> -> memref<1x!tpu.dma_semaphore, #tpu.memory_space<semaphore_mem>>
    %167 = tpu.memref_squeeze %166 : memref<1x!tpu.dma_semaphore, #tpu.memory_space<semaphore_mem>> -> memref<!tpu.dma_semaphore, #tpu.memory_space<semaphore_mem>>
    tpu.wait_dma2 semaphore(%167 : memref<!tpu.dma_semaphore, #tpu.memory_space<semaphore_mem>>) src(%164 : memref<1x5xf32, #tpu.memory_space<any>>) dst(%165 : memref<1x5xf32, #tpu.memory_space<vmem>>)
    %c7_i32_150 = arith.constant 7 : i32
    %c0_i32_151 = arith.constant 0 : i32
    %168 = tpu.memref_slice %arg3[%100, %c0_i32_151] : memref<2001x5xf32, #tpu.memory_space<any>> -> memref<1x5xf32, #tpu.memory_space<any>>
    %c7_i32_152 = arith.constant 7 : i32
    %c0_i32_153 = arith.constant 0 : i32
    %169 = tpu.memref_slice %arg6[%c7_i32_152, %c0_i32_153] : memref<8x5xf32, #tpu.memory_space<vmem>> -> memref<1x5xf32, #tpu.memory_space<vmem>>
    %170 = tpu.memref_slice %arg8[%c7_i32_150] : memref<8x!tpu.dma_semaphore, #tpu.memory_space<semaphore_mem>> -> memref<1x!tpu.dma_semaphore, #tpu.memory_space<semaphore_mem>>
    %171 = tpu.memref_squeeze %170 : memref<1x!tpu.dma_semaphore, #tpu.memory_space<semaphore_mem>> -> memref<!tpu.dma_semaphore, #tpu.memory_space<semaphore_mem>>
    tpu.wait_dma2 semaphore(%171 : memref<!tpu.dma_semaphore, #tpu.memory_space<semaphore_mem>>) src(%168 : memref<1x5xf32, #tpu.memory_space<any>>) dst(%169 : memref<1x5xf32, #tpu.memory_space<vmem>>)
    %c7_i32_154 = arith.constant 7 : i32
    %c0_i32_155 = arith.constant 0 : i32
    %172 = tpu.memref_slice %arg4[%103, %c0_i32_155] : memref<10001x5xf32, #tpu.memory_space<any>> -> memref<1x5xf32, #tpu.memory_space<any>>
    %c7_i32_156 = arith.constant 7 : i32
    %c0_i32_157 = arith.constant 0 : i32
    %173 = tpu.memref_slice %arg7[%c7_i32_156, %c0_i32_157] : memref<8x5xf32, #tpu.memory_space<vmem>> -> memref<1x5xf32, #tpu.memory_space<vmem>>
    %174 = tpu.memref_slice %arg9[%c7_i32_154] : memref<8x!tpu.dma_semaphore, #tpu.memory_space<semaphore_mem>> -> memref<1x!tpu.dma_semaphore, #tpu.memory_space<semaphore_mem>>
    %175 = tpu.memref_squeeze %174 : memref<1x!tpu.dma_semaphore, #tpu.memory_space<semaphore_mem>> -> memref<!tpu.dma_semaphore, #tpu.memory_space<semaphore_mem>>
    tpu.wait_dma2 semaphore(%175 : memref<!tpu.dma_semaphore, #tpu.memory_space<semaphore_mem>>) src(%172 : memref<1x5xf32, #tpu.memory_space<any>>) dst(%173 : memref<1x5xf32, #tpu.memory_space<vmem>>)
    %c0_158 = arith.constant 0 : index
    %c0_159 = arith.constant 0 : index
    %176 = vector.load %arg6[%c0_158, %c0_159] : memref<8x5xf32, #tpu.memory_space<vmem>>, vector<8x5xf32>
    %c0_160 = arith.constant 0 : index
    %c0_161 = arith.constant 0 : index
    %177 = vector.load %arg7[%c0_160, %c0_161] : memref<8x5xf32, #tpu.memory_space<vmem>>, vector<8x5xf32>
    %178 = arith.mulf %176, %177 : vector<8x5xf32>
    %cst = arith.constant dense<0.000000e+00> : vector<8xf32>
    %179 = vector.multi_reduction <add>, %178, %cst [1] : vector<8x5xf32> to vector<8xf32>
    %180 = vector.shape_cast %179 : vector<8xf32> to vector<1x8xf32>
    %c0_162 = arith.constant 0 : index
    %c0_163 = arith.constant 0 : index
    %181 = vector.load %arg5[%c0_162, %c0_163] : memref<1x8xf32, #tpu.memory_space<vmem>>, vector<1x8xf32>
    tpu.vector_store %arg5[%c0_162, %c0_163], %180 {strides = array<i32>} : memref<1x8xf32, #tpu.memory_space<vmem>>, vector<1x8xf32>,
    return
  }
  func.func @transform_2(%arg0: i32, %arg1: memref<8xi32, #tpu.memory_space<smem>>, %arg2: memref<8xi32, #tpu.memory_space<smem>>) -> (i32, i32) {
    %c0_i32 = arith.constant 0 : i32
    %c0_i32_0 = arith.constant 0 : i32
    %c0_i32_1 = arith.constant 0 : i32
    return %c0_i32, %c0_i32_0 : i32, i32
  }
}

</mosaic_0001>

<bundles_post_ra>
// kernel: tpu_custom_call.1
= control target key start
LH: loop header
LB: loop body
LE: loop exit
PB: predicated region body
PF: predicated region fallthrough
CT: control target
= control target key end

     0   :  { %s1173_s21 = smov [#allocation7]   ;;  %s1174_s22 = smov [#allocation8]   ;;  %s1258_s0 = inlined_call_operand.vmem [shape: s32[8], index: 0, kind: input, shape index: {}]   ;;  %s1259_s2 = inlined_call_operand.vmem [shape: f32[2001,5], index: 2, kind: input, shape index: {}]   ;;  %s1260_s3 = inlined_call_operand.vmem [shape: f32[10001,5], index: 3, kind: input, shape index: {}]   ;;  %s1261_s4 = inlined_call_operand.hbm [shape: f32[1,8], index: 4, kind: output, shape index: {}]   ;;  %s1262_s1 = inlined_call_operand.vmem [shape: s32[8], index: 1, kind: input, shape index: {}]  }
   0x1   :  { %s10_s17 = sshll.u32 %s1258_s0, 4  ;;  %s15_s20 = sshll.u32 %s1262_s1, 4  ;;  %s11_s17 = int_to_ptr.vmem [resolvable:$true] %s10_s17  ;;  %s16_s20 = int_to_ptr.vmem [resolvable:$true] %s15_s20 }
   0x2   :  { %13 = dma.vmem_to_smem %s11_s17, 16, %s1173_s21, [#allocation6] }
   0x3   :  { %18 = dma.vmem_to_smem %s16_s20, 16, %s1174_s22, [#allocation6] }
   0x4   :  { %1137 = dma.done.wait [#allocation6], 32 }
   0x5   :  { %1138 = vsyncadd [#allocation6], 4294967264 }
   0x6   :  { %21 = sfence }
   0x7   :  { %22 = vsyncpa [#allocation10], 0  ;;  %s23_s23 = sld [smem:[#allocation7]] }
   0x8   :  { %s28_s24 = sld [smem:[#allocation8]] }
   0xd   :  { %p24_p0 = scmp.gt.s32.totalorder %s23_s23, 0  ;;  %p944_p1 = scmp.lt.s32.totalorder %s23_s23, 2000 }
   0xe   :  { %p29_p2 = scmp.gt.s32.totalorder %s28_s24, 0  ;;  %p949_p3 = scmp.lt.s32.totalorder %s28_s24, 10000 }
   0xf   :  { %s1264_s23 = smov (!%p24_p0, %s23_s23), 0 }
  0x10   :  { %s1266_s24 = smov (!%p29_p2, %s28_s24), 0  ;;  %s1268_s23 = smov (!%p944_p1, %s1264_s23), 2000 }
  0x11   :  { %s1270_s24 = smov (!%p949_p3, %s1266_s24), 10000  ;;  %s33_s25 = scalar_lea.vmem %s1259_s2, %s1268_s23 }
  0x12   :  { %v48_v0 = vld [vmem:[%s33_s25] sm:$0x1] }
  0x13   :  { %49 = vst [vmem:[#allocation2] sm:$0x1] %v48_v0 }
  0x14   :  { %67 = vsyncadd [#allocation4], 16  ;;  %s68_s28 = scalar_lea.vmem %s1260_s3, %s1270_s24 }
  0x15   :  { %v83_v1 = vld [vmem:[%s68_s28] sm:$0x1] }
  0x16   :  { %84 = vst [vmem:[#allocation3] sm:$0x1] %v83_v1 }
  0x17   :  { %102 = vsyncadd [#allocation5], 16  ;;  %s954_s29 = sld [smem:[#allocation7 + $0x1]] }
  0x18   :  { %s960_s30 = sld [smem:[#allocation8 + $0x1]] }
  0x1d   :  { %p104_p4 = scmp.gt.s32.totalorder %s954_s29, 0  ;;  %p955_p5 = scmp.lt.s32.totalorder %s954_s29, 2000 }
  0x1e   :  { %p109_p6 = scmp.gt.s32.totalorder %s960_s30, 0  ;;  %p961_p7 = scmp.lt.s32.totalorder %s960_s30, 10000 }
  0x1f   :  { %s1272_s29 = smov (!%p104_p4, %s954_s29), 0 }
  0x20   :  { %s1274_s30 = smov (!%p109_p6, %s960_s30), 0  ;;  %s1276_s29 = smov (!%p955_p5, %s1272_s29), 2000 }
  0x21   :  { %s1278_s30 = smov (!%p961_p7, %s1274_s30), 10000  ;;  %s113_s7 = scalar_lea.vmem %s1259_s2, %s1276_s29 }
  0x22   :  { %v130_v2 = vld [vmem:[%s113_s7] sm:$0x1] }
  0x23   :  { %131 = vst [vmem:[#allocation2 + $0x1] sm:$0x1] %v130_v2 }
  0x24   :  { %149 = vsyncadd [#allocation4 + $0x1], 16  ;;  %s150_s10 = scalar_lea.vmem %s1260_s3, %s1278_s30 }
  0x25   :  { %v167_v3 = vld [vmem:[%s150_s10] sm:$0x1] }
  0x26   :  { %168 = vst [vmem:[#allocation3 + $0x1] sm:$0x1] %v167_v3 }
  0x27   :  { %186 = vsyncadd [#allocation5 + $0x1], 16  ;;  %s966_s11 = sld [smem:[#allocation7 + $0x2]] }
  0x28   :  { %s972_s12 = sld [smem:[#allocation8 + $0x2]] }
  0x2d   :  { %p188_p8 = scmp.gt.s32.totalorder %s966_s11, 0  ;;  %p967_p9 = scmp.lt.s32.totalorder %s966_s11, 2000 }
  0x2e   :  { %p193_p10 = scmp.gt.s32.totalorder %s972_s12, 0  ;;  %p973_p11 = scmp.lt.s32.totalorder %s972_s12, 10000 }
  0x2f   :  { %s1280_s11 = smov (!%p188_p8, %s966_s11), 0 }
  0x30   :  { %s1282_s12 = smov (!%p193_p10, %s972_s12), 0  ;;  %s1284_s11 = smov (!%p967_p9, %s1280_s11), 2000 }
  0x31   :  { %s1286_s12 = smov (!%p973_p11, %s1282_s12), 10000  ;;  %s197_s15 = scalar_lea.vmem %s1259_s2, %s1284_s11 }
  0x32   :  { %v214_v4 = vld [vmem:[%s197_s15] sm:$0x1] }
  0x33   :  { %215 = vst [vmem:[#allocation2 + $0x2] sm:$0x1] %v214_v4 }
  0x34   :  { %233 = vsyncadd [#allocation4 + $0x2], 16  ;;  %s234_s18 = scalar_lea.vmem %s1260_s3, %s1286_s12 }
  0x35   :  { %v251_v5 = vld [vmem:[%s234_s18] sm:$0x1] }
  0x36   :  { %252 = vst [vmem:[#allocation3 + $0x2] sm:$0x1] %v251_v5 }
  0x37   :  { %270 = vsyncadd [#allocation5 + $0x2], 16  ;;  %s978_s19 = sld [smem:[#allocation7 + $0x3]] }
  0x38   :  { %s984_s20 = sld [smem:[#allocation8 + $0x3]] }
  0x3d   :  { %p272_p12 = scmp.gt.s32.totalorder %s978_s19, 0  ;;  %p979_p13 = scmp.lt.s32.totalorder %s978_s19, 2000 }
  0x3e   :  { %p277_p0 = scmp.gt.s32.totalorder %s984_s20, 0  ;;  %p985_p1 = scmp.lt.s32.totalorder %s984_s20, 10000 }
  0x3f   :  { %s1288_s19 = smov (!%p272_p12, %s978_s19), 0 }
  0x40   :  { %s1290_s20 = smov (!%p277_p0, %s984_s20), 0  ;;  %s1292_s19 = smov (!%p979_p13, %s1288_s19), 2000 }
  0x41   :  { %s1294_s20 = smov (!%p985_p1, %s1290_s20), 10000  ;;  %s281_s23 = scalar_lea.vmem %s1259_s2, %s1292_s19 }
  0x42   :  { %v298_v6 = vld [vmem:[%s281_s23] sm:$0x1] }
  0x43   :  { %299 = vst [vmem:[#allocation2 + $0x3] sm:$0x1] %v298_v6 }
  0x44   :  { %317 = vsyncadd [#allocation4 + $0x3], 16  ;;  %s318_s1 = scalar_lea.vmem %s1260_s3, %s1294_s20 }
  0x45   :  { %v335_v7 = vld [vmem:[%s318_s1] sm:$0x1] }
  0x46   :  { %336 = vst [vmem:[#allocation3 + $0x3] sm:$0x1] %v335_v7 }
  0x47   :  { %354 = vsyncadd [#allocation5 + $0x3], 16  ;;  %s990_s25 = sld [smem:[#allocation7 + $0x4]] }
  0x48   :  { %s996_s26 = sld [smem:[#allocation8 + $0x4]] }
  0x4d   :  { %p356_p2 = scmp.gt.s32.totalorder %s990_s25, 0  ;;  %p991_p3 = scmp.lt.s32.totalorder %s990_s25, 2000 }
  0x4e   :  { %p361_p4 = scmp.gt.s32.totalorder %s996_s26, 0  ;;  %p997_p5 = scmp.lt.s32.totalorder %s996_s26, 10000 }
  0x4f   :  { %s1296_s25 = smov (!%p356_p2, %s990_s25), 0 }
  0x50   :  { %s1298_s26 = smov (!%p361_p4, %s996_s26), 0  ;;  %s1300_s25 = smov (!%p991_p3, %s1296_s25), 2000 }
  0x51   :  { %s1302_s26 = smov (!%p997_p5, %s1298_s26), 10000  ;;  %s365_s29 = scalar_lea.vmem %s1259_s2, %s1300_s25 }
  0x52   :  { %v382_v8 = vld [vmem:[%s365_s29] sm:$0x1] }
  0x53   :  { %383 = vst [vmem:[#allocation2 + $0x4] sm:$0x1] %v382_v8 }
  0x54   :  { %401 = vsyncadd [#allocation4 + $0x4], 16  ;;  %s402_s6 = scalar_lea.vmem %s1260_s3, %s1302_s26 }
  0x55   :  { %v419_v9 = vld [vmem:[%s402_s6] sm:$0x1] }
  0x56   :  { %420 = vst [vmem:[#allocation3 + $0x4] sm:$0x1] %v419_v9 }
  0x57   :  { %438 = vsyncadd [#allocation5 + $0x4], 16  ;;  %s1002_s7 = sld [smem:[#allocation7 + $0x5]] }
  0x58   :  { %s1008_s8 = sld [smem:[#allocation8 + $0x5]] }
  0x5d   :  { %p440_p6 = scmp.gt.s32.totalorder %s1002_s7, 0  ;;  %p1003_p7 = scmp.lt.s32.totalorder %s1002_s7, 2000 }
  0x5e   :  { %p445_p8 = scmp.gt.s32.totalorder %s1008_s8, 0  ;;  %p1009_p9 = scmp.lt.s32.totalorder %s1008_s8, 10000 }
  0x5f   :  { %s1304_s7 = smov (!%p440_p6, %s1002_s7), 0 }
  0x60   :  { %s1306_s8 = smov (!%p445_p8, %s1008_s8), 0  ;;  %s1308_s7 = smov (!%p1003_p7, %s1304_s7), 2000 }
  0x61   :  { %s1310_s8 = smov (!%p1009_p9, %s1306_s8), 10000  ;;  %s449_s11 = scalar_lea.vmem %s1259_s2, %s1308_s7 }
  0x62   :  { %v466_v10 = vld [vmem:[%s449_s11] sm:$0x1] }
  0x63   :  { %467 = vst [vmem:[#allocation2 + $0x5] sm:$0x1] %v466_v10 }
  0x64   :  { %485 = vsyncadd [#allocation4 + $0x5], 16  ;;  %s486_s14 = scalar_lea.vmem %s1260_s3, %s1310_s8 }
  0x65   :  { %v503_v11 = vld [vmem:[%s486_s14] sm:$0x1] }
  0x66   :  { %504 = vst [vmem:[#allocation3 + $0x5] sm:$0x1] %v503_v11 }
  0x67   :  { %522 = vsyncadd [#allocation5 + $0x5], 16  ;;  %s1014_s15 = sld [smem:[#allocation7 + $0x6]] }
  0x68   :  { %s1020_s16 = sld [smem:[#allocation8 + $0x6]] }
  0x6d   :  { %p524_p10 = scmp.gt.s32.totalorder %s1014_s15, 0  ;;  %p1015_p11 = scmp.lt.s32.totalorder %s1014_s15, 2000 }
  0x6e   :  { %p529_p12 = scmp.gt.s32.totalorder %s1020_s16, 0  ;;  %p1021_p13 = scmp.lt.s32.totalorder %s1020_s16, 10000 }
  0x6f   :  { %s1312_s15 = smov (!%p524_p10, %s1014_s15), 0 }
  0x70   :  { %s1314_s16 = smov (!%p529_p12, %s1020_s16), 0  ;;  %s1316_s15 = smov (!%p1015_p11, %s1312_s15), 2000 }
  0x71   :  { %s1318_s16 = smov (!%p1021_p13, %s1314_s16), 10000  ;;  %s533_s19 = scalar_lea.vmem %s1259_s2, %s1316_s15 }
  0x72   :  { %v550_v12 = vld [vmem:[%s533_s19] sm:$0x1] }
  0x73   :  { %551 = vst [vmem:[#allocation2 + $0x6] sm:$0x1] %v550_v12 }
  0x74   :  { %569 = vsyncadd [#allocation4 + $0x6], 16  ;;  %s570_s22 = scalar_lea.vmem %s1260_s3, %s1318_s16 }
  0x75   :  { %v587_v13 = vld [vmem:[%s570_s22] sm:$0x1] }
  0x76   :  { %588 = vst [vmem:[#allocation3 + $0x6] sm:$0x1] %v587_v13 }
  0x77   :  { %606 = vsyncadd [#allocation5 + $0x6], 16  ;;  %s1026_s23 = sld [smem:[#allocation7 + $0x7]] }
  0x78   :  { %s1032_s24 = sld [smem:[#allocation8 + $0x7]] }
  0x7d   :  { %p608_p0 = scmp.gt.s32.totalorder %s1026_s23, 0  ;;  %p1027_p1 = scmp.lt.s32.totalorder %s1026_s23, 2000 }
  0x7e   :  { %p613_p2 = scmp.gt.s32.totalorder %s1032_s24, 0  ;;  %p1033_p3 = scmp.lt.s32.totalorder %s1032_s24, 10000 }
  0x7f   :  { %s1320_s23 = smov (!%p608_p0, %s1026_s23), 0 }
  0x80   :  { %s1322_s24 = smov (!%p613_p2, %s1032_s24), 0  ;;  %s1324_s23 = smov (!%p1027_p1, %s1320_s23), 2000 }
  0x81   :  { %s1326_s24 = smov (!%p1033_p3, %s1322_s24), 10000  ;;  %s617_s25 = scalar_lea.vmem %s1259_s2, %s1324_s23 }
  0x82   :  { %v634_v14 = vld [vmem:[%s617_s25] sm:$0x1] }
  0x83   :  { %635 = vst [vmem:[#allocation2 + $0x7] sm:$0x1] %v634_v14 }
  0x84   :  { %653 = vsyncadd [#allocation4 + $0x7], 16  ;;  %s654_s28 = scalar_lea.vmem %s1260_s3, %s1326_s24 }
  0x85   :  { %v671_v15 = vld [vmem:[%s654_s28] sm:$0x1] }
  0x86   :  { %672 = vst [vmem:[#allocation3 + $0x7] sm:$0x1] %v671_v15 }
  0x87   :  { %690 = vsyncadd [#allocation5 + $0x7], 16 }
  0x88   :  { %1139 = dma.done.wait [#allocation4], 16 }
  0x89   :  { %1140 = vsyncadd [#allocation4], 4294967280 }
  0x8a   :  { %1141 = dma.done.wait [#allocation5], 16 }
  0x8b   :  { %1142 = vsyncadd [#allocation5], 4294967280 }
  0x8c   :  { %1143 = dma.done.wait [#allocation4 + $0x1], 16 }
  0x8d   :  { %1144 = vsyncadd [#allocation4 + $0x1], 4294967280 }
  0x8e   :  { %1145 = dma.done.wait [#allocation5 + $0x1], 16 }
  0x8f   :  { %1146 = vsyncadd [#allocation5 + $0x1], 4294967280 }
  0x90   :  { %1147 = dma.done.wait [#allocation4 + $0x2], 16 }
  0x91   :  { %1148 = vsyncadd [#allocation4 + $0x2], 4294967280 }
  0x92   :  { %1149 = dma.done.wait [#allocation5 + $0x2], 16 }
  0x93   :  { %1150 = vsyncadd [#allocation5 + $0x2], 4294967280 }
  0x94   :  { %1151 = dma.done.wait [#allocation4 + $0x3], 16 }
  0x95   :  { %1152 = vsyncadd [#allocation4 + $0x3], 4294967280 }
  0x96   :  { %1153 = dma.done.wait [#allocation5 + $0x3], 16 }
  0x97   :  { %1154 = vsyncadd [#allocation5 + $0x3], 4294967280 }
  0x98   :  { %1155 = dma.done.wait [#allocation4 + $0x4], 16 }
  0x99   :  { %1156 = vsyncadd [#allocation4 + $0x4], 4294967280 }
  0x9a   :  { %1157 = dma.done.wait [#allocation5 + $0x4], 16 }
  0x9b   :  { %1158 = vsyncadd [#allocation5 + $0x4], 4294967280 }
  0x9c   :  { %1159 = dma.done.wait [#allocation4 + $0x5], 16 }
  0x9d   :  { %1160 = vsyncadd [#allocation4 + $0x5], 4294967280 }
  0x9e   :  { %1161 = dma.done.wait [#allocation5 + $0x5], 16 }
  0x9f   :  { %1162 = vsyncadd [#allocation5 + $0x5], 4294967280 }
  0xa0   :  { %1163 = dma.done.wait [#allocation4 + $0x6], 16 }
  0xa1   :  { %1164 = vsyncadd [#allocation4 + $0x6], 4294967280 }
  0xa2   :  { %1165 = dma.done.wait [#allocation5 + $0x6], 16 }
  0xa3   :  { %1166 = vsyncadd [#allocation5 + $0x6], 4294967280 }
  0xa4   :  { %1167 = dma.done.wait [#allocation4 + $0x7], 16 }
  0xa5   :  { %1168 = vsyncadd [#allocation4 + $0x7], 4294967280 }
  0xa6   :  { %1169 = dma.done.wait [#allocation5 + $0x7], 16 }
  0xa7   :  { %1170 = vsyncadd [#allocation5 + $0x7], 4294967280  ;;  %v724_v16 = vld [vmem:[#allocation2] sm:$0xff]  ;;  %v725_v17 = vld [vmem:[#allocation3] sm:$0xff]  ;;  %vm727_vm0 = vcmask 39936   ;;  %v732_v20 = vlaneseq  ;;  %s1175_s2 = smov [#allocation9]  }
  0xa8   :  { %v726_v18 = vmul.f32 %v725_v17, %v724_v16  ;;  %s743_s3 = sshll.u32 %s1175_s2, 4  ;;  %s745_s5 = sshll.u32 %s1261_s4, 4  ;;  %vm736_vm1 = vcmask 57344   ;;  %s744_s3 = int_to_ptr.vmem [resolvable:$true] %s743_s3  ;;  %s746_s5 = int_to_ptr.hbm [resolvable:$true] %s745_s5 }
  0xa9   :  { %v733_v21 = vand.u32 127, %v732_v20 }
  0xaa   :  { %v728_v19 = vsel %vm727_vm0, %v726_v18, 0.0 }
  0xab   :  { %729 = vadd.xlane.f32.xlu0 %v728_v19 }
 0x11e   :  { %v730_v22 = vpop.xlane.xlu0 %729 }
 0x11f   :  { %v734_v23 = vperm.slane %v730_v22, %v733_v21 }
 0x121   :  { %737 = vst.msk [vmem:[#allocation9] sm:$0x1] %vm736_vm1, %v734_v23 }
 0x122   :  { %748 = dma.vmem_to_hbm [thread:$0]  %s744_s3, 16, %s746_s5, [#allocation10]  }
 0x123   :  { %1171 = dma.done.wait [#allocation10], 16  }
 0x124   :  { %1172 = vsyncadd [#allocation10], 4294967280 }
 0x125   :  { %753 = vsyncpa [#allocation10], 1 }
 0x126   :  { %754 = vsyncmov [#allocation4] }
 0x129   :  { %s755_s6 = vpop.sfrf %754 }
 0x12a   :  { %p1038_p4 = scmp.ne.s32.totalorder %s755_s6, 0 }
 0x12c   :  { %759 = shalt.err (%p1038_p4)  }
 0x12d   :  { %761 = vsyncmov [#allocation4 + $0x1] }
 0x130   :  { %s762_s7 = vpop.sfrf %761 }
 0x131   :  { %p1039_p5 = scmp.ne.s32.totalorder %s762_s7, 0 }
 0x133   :  { %766 = shalt.err (%p1039_p5)  }
 0x134   :  { %768 = vsyncmov [#allocation4 + $0x2] }
 0x137   :  { %s769_s4 = vpop.sfrf %768 }
 0x138   :  { %p1040_p6 = scmp.ne.s32.totalorder %s769_s4, 0 }
 0x13a   :  { %773 = shalt.err (%p1040_p6)  }
 0x13b   :  { %775 = vsyncmov [#allocation4 + $0x3] }
 0x13e   :  { %s776_s8 = vpop.sfrf %775 }
 0x13f   :  { %p1041_p7 = scmp.ne.s32.totalorder %s776_s8, 0 }
 0x141   :  { %780 = shalt.err (%p1041_p7)  }
 0x142   :  { %782 = vsyncmov [#allocation4 + $0x4] }
 0x145   :  { %s783_s9 = vpop.sfrf %782 }
 0x146   :  { %p1042_p8 = scmp.ne.s32.totalorder %s783_s9, 0 }
 0x148   :  { %787 = shalt.err (%p1042_p8)  }
 0x149   :  { %789 = vsyncmov [#allocation4 + $0x5] }
 0x14c   :  { %s790_s10 = vpop.sfrf %789 }
 0x14d   :  { %p1043_p9 = scmp.ne.s32.totalorder %s790_s10, 0 }
 0x14f   :  { %794 = shalt.err (%p1043_p9)  }
 0x150   :  { %796 = vsyncmov [#allocation4 + $0x6] }
 0x153   :  { %s797_s11 = vpop.sfrf %796 }
 0x154   :  { %p1044_p10 = scmp.ne.s32.totalorder %s797_s11, 0 }
 0x156   :  { %801 = shalt.err (%p1044_p10)  }
 0x157   :  { %803 = vsyncmov [#allocation4 + $0x7] }
 0x15a   :  { %s804_s12 = vpop.sfrf %803 }
 0x15b   :  { %p1045_p11 = scmp.ne.s32.totalorder %s804_s12, 0 }
 0x15d   :  { %808 = shalt.err (%p1045_p11)  }
 0x15e   :  { %809 = vsyncmov [#allocation5] }
 0x161   :  { %s810_s13 = vpop.sfrf %809 }
 0x162   :  { %p1046_p12 = scmp.ne.s32.totalorder %s810_s13, 0 }
 0x164   :  { %814 = shalt.err (%p1046_p12)  }
 0x165   :  { %816 = vsyncmov [#allocation5 + $0x1] }
 0x168   :  { %s817_s14 = vpop.sfrf %816 }
 0x169   :  { %p1047_p13 = scmp.ne.s32.totalorder %s817_s14, 0 }
 0x16b   :  { %821 = shalt.err (%p1047_p13)  }
 0x16c   :  { %823 = vsyncmov [#allocation5 + $0x2] }
 0x16f   :  { %s824_s15 = vpop.sfrf %823 }
 0x170   :  { %p1048_p0 = scmp.ne.s32.totalorder %s824_s15, 0 }
 0x172   :  { %828 = shalt.err (%p1048_p0)  }
 0x173   :  { %830 = vsyncmov [#allocation5 + $0x3] }
 0x176   :  { %s831_s16 = vpop.sfrf %830 }
 0x177   :  { %p1049_p1 = scmp.ne.s32.totalorder %s831_s16, 0 }
 0x179   :  { %835 = shalt.err (%p1049_p1)  }
 0x17a   :  { %837 = vsyncmov [#allocation5 + $0x4] }
 0x17d   :  { %s838_s17 = vpop.sfrf %837 }
 0x17e   :  { %p1050_p2 = scmp.ne.s32.totalorder %s838_s17, 0 }
 0x180   :  { %842 = shalt.err (%p1050_p2)  }
 0x181   :  { %844 = vsyncmov [#allocation5 + $0x5] }
 0x184   :  { %s845_s18 = vpop.sfrf %844 }
 0x185   :  { %p1051_p3 = scmp.ne.s32.totalorder %s845_s18, 0 }
 0x187   :  { %849 = shalt.err (%p1051_p3)  }
 0x188   :  { %851 = vsyncmov [#allocation5 + $0x6] }
 0x18b   :  { %s852_s19 = vpop.sfrf %851 }
 0x18c   :  { %p1052_p4 = scmp.ne.s32.totalorder %s852_s19, 0 }
 0x18e   :  { %856 = shalt.err (%p1052_p4)  }
 0x18f   :  { %858 = vsyncmov [#allocation5 + $0x7] }
 0x192   :  { %s859_s20 = vpop.sfrf %858 }
 0x193   :  { %p1053_p5 = scmp.ne.s32.totalorder %s859_s20, 0 }
 0x195   :  { %863 = shalt.err (%p1053_p5)  }

</bundles_post_ra>
